<compile_context>
chip_gen: v7x
topology: tpu7x:2x2x1
jax: 0.10.0
libtpu: 0.0.40
codegen_flags: <defaults>
</compile_context>

<pallas_src>
import jax
import jax.numpy as jnp
from jax.experimental import pallas as pl
from jax.experimental.pallas import tpu as pltpu

STD = 1.0

# Per-input-tile VMEM budget: 2 inputs x 2 pipeline buffers x 2 MiB = 8 MiB,
# plus the (tb, 1) output tiles, stays well inside every generation's VMEM.
_TILE_VMEM_BUDGET = 2 * 1024 * 1024
_TB_CAP = 4096


def _round_up(x, m):
    return (x + m - 1) // m * m


def mf_dot_kernel(u_ref, i_ref, o_ref):
    """One batch tile: elementwise multiply + lane-axis reduce.

    u_ref, i_ref : (tb, k) f32 gathered embedding rows
    o_ref        : (tb, 1) f32 per-example dot products
    """
    o_ref[...] = jnp.sum(u_ref[...] * i_ref[...], axis=-1, keepdims=True)


def mf_forward(user_mat, item_mat, uid, iid):
    n_user, k = user_mat.shape
    n_item, k2 = item_mat.shape
    assert k == k2
    B = uid.shape[0]

    # ---- batch tile selection -------------------------------------------
    # A (tb, k) f32 tile occupies tb * round_up(k, 128) * 4 bytes of VMEM
    # (minor dim pads to 128 lanes).  Budget ~2 MiB per tile; at k=16 that is
    # tb = 4096 rows per step, large enough to amortize the ~0.35 us
    # per-grid-step overhead against each step's HBM traffic.
    lane_bytes = _round_up(k, 128) * 4
    tb_cap = max(128, (_TILE_VMEM_BUDGET // lane_bytes) // 128 * 128)
    tb = min(tb_cap, _TB_CAP)

    b_pad = _round_up(max(B, 128), 128)
    # Keep >= 2 grid steps whenever the batch allows it so v7x's second
    # TensorCore is not idled (batch axis is marked "parallel").
    if b_pad >= 256:
        tb = min(tb, _round_up(b_pad // 2, 128))
    tb = max(128, min(tb, b_pad))
    b_pad = _round_up(b_pad, tb)

    # ---- embedding-row gather (XLA) ---------------------------------------
    # Contiguous-row gather; no transpose afterwards, so the gathered slabs
    # are written once and read once (and may fuse into the kernel's input
    # DMA entirely via allow_input_fusion).
    # Note: jnp.take clamps out-of-range ids instead of faulting.
    uid_p = jnp.pad(uid.astype(jnp.int32), (0, b_pad - B))
    iid_p = jnp.pad(iid.astype(jnp.int32), (0, b_pad - B))
    u_rows = jnp.take(user_mat, uid_p, axis=0)   # (b_pad, k)
    i_rows = jnp.take(item_mat, iid_p, axis=0)   # (b_pad, k)

    out = pl.pallas_call(
        mf_dot_kernel,
        out_shape=jax.ShapeDtypeStruct((b_pad, 1), jnp.float32),
        grid_spec=pltpu.PrefetchScalarGridSpec(
            num_scalar_prefetch=0,
            grid=(b_pad // tb,),
            in_specs=[
                pl.BlockSpec((tb, k), lambda t: (t, 0)),
                pl.BlockSpec((tb, k), lambda t: (t, 0)),
            ],
            out_specs=pl.BlockSpec((tb, 1), lambda t: (t, 0)),
        ),
        compiler_params=pltpu.CompilerParams(
            # Independent batch tiles -> megacore sharding on v7x.
            dimension_semantics=("parallel",),
            # Permit XLA to fuse the row gathers into the input DMA so the
            # gathered (b_pad, k) slabs need not materialize in HBM.
            allow_input_fusion=[True, True],
            # Explicit headroom so v5e's 16 MiB scoped-VMEM default cannot
            # force smaller pipeline buffers (physical VMEM is far larger).
            vmem_limit_bytes=32 * 1024 * 1024,
        ),
    )(u_rows, i_rows)

    # Padded tail lanes hold garbage dot products (row-0 gathers); this slice
    # discards them and is load-bearing.
    return out[:B, 0]


if __name__ == "__main__":
    # Small, deterministic setup consistent with MF.__init__ (k=16).
    n_user, n_item, k, B = 64, 48, 16, 8

    key = jax.random.PRNGKey(0)
    k_user, k_item, k_uid, k_iid = jax.random.split(key, 4)

    # nn.init.normal_(std=STD) equivalent, deterministic in-script.
    user_mat = STD * jax.random.normal(k_user, (n_user, k), dtype=jnp.float32)
    item_mat = STD * jax.random.normal(k_item, (n_item, k), dtype=jnp.float32)

    uid = jax.random.randint(k_uid, (B,), 0, n_user, dtype=jnp.int32)
    iid = jax.random.randint(k_iid, (B,), 0, n_item, dtype=jnp.int32)

    mf = jax.jit(mf_forward)
    out = jax.block_until_ready(mf(user_mat, item_mat, uid, iid))

    # Pure-JAX reference for correctness.
    ref = jnp.sum(user_mat[uid] * item_mat[iid], axis=1)
    assert out.shape == (B,) and out.dtype == jnp.float32
    assert jnp.allclose(out, ref, atol=1e-5, rtol=1e-5), (out, ref)

    # Also exercise the multi-tile (>= 2 grid steps) path.
    B2 = 300
    uid2 = jax.random.randint(jax.random.PRNGKey(1), (B2,), 0, n_user, dtype=jnp.int32)
    iid2 = jax.random.randint(jax.random.PRNGKey(2), (B2,), 0, n_item, dtype=jnp.int32)
    out2 = jax.block_until_ready(mf(user_mat, item_mat, uid2, iid2))
    ref2 = jnp.sum(user_mat[uid2] * item_mat[iid2], axis=1)
    assert out2.shape == (B2,)
    assert jnp.allclose(out2, ref2, atol=1e-5, rtol=1e-5)

    print("KERNEL_OK")
</pallas_src>

<mosaic_0001>
module attributes {stable_mosaic.version = 11 : i64} {
  func.func @mf_dot_kernel(%arg0: i32, %arg1: memref<128x16xf32, #tpu.memory_space<vmem>>, %arg2: memref<128x16xf32, #tpu.memory_space<vmem>>, %arg3: memref<128x1xf32, #tpu.memory_space<vmem>>) attributes {dimension_semantics = [#tpu.dimension_semantics<parallel>], iteration_bounds = array<i64: 1>, scalar_prefetch = 0 : i64, scratch_operands = 0 : i64, tpu.core_type = #tpu.core_type<tc>, window_params = [{transform_indices = @transform_0, window_bounds = array<i64: 128, 16>}, {transform_indices = @transform_1, window_bounds = array<i64: 128, 16>}, {transform_indices = @transform_2, window_bounds = array<i64: 128, 1>}]} {
    %c0 = arith.constant 0 : index
    %c0_0 = arith.constant 0 : index
    %0 = vector.load %arg1[%c0, %c0_0] : memref<128x16xf32, #tpu.memory_space<vmem>>, vector<128x16xf32>
    %c0_1 = arith.constant 0 : index
    %c0_2 = arith.constant 0 : index
    %1 = vector.load %arg2[%c0_1, %c0_2] : memref<128x16xf32, #tpu.memory_space<vmem>>, vector<128x16xf32>
    %2 = arith.mulf %0, %1 : vector<128x16xf32>
    %cst = arith.constant dense<0.000000e+00> : vector<128xf32>
    %3 = vector.multi_reduction <add>, %2, %cst [1] : vector<128x16xf32> to vector<128xf32>
    %4 = vector.shape_cast %3 : vector<128xf32> to vector<128x1xf32>
    %c0_3 = arith.constant 0 : index
    %c0_4 = arith.constant 0 : index
    %5 = vector.load %arg3[%c0_3, %c0_4] : memref<128x1xf32, #tpu.memory_space<vmem>>, vector<128x1xf32>
    tpu.vector_store %arg3[%c0_3, %c0_4], %4 {strides = array<i32>} : memref<128x1xf32, #tpu.memory_space<vmem>>, vector<128x1xf32>,
    return
  }
  func.func @transform_0(%arg0: i32) -> (i32, i32) {
    %c0_i32 = arith.constant 0 : i32
    %c0_i32_0 = arith.constant 0 : i32
    return %arg0, %c0_i32 : i32, i32
  }
  func.func @transform_1(%arg0: i32) -> (i32, i32) {
    %c0_i32 = arith.constant 0 : i32
    %c0_i32_0 = arith.constant 0 : i32
    return %arg0, %c0_i32 : i32, i32
  }
  func.func @transform_2(%arg0: i32) -> (i32, i32) {
    %c0_i32 = arith.constant 0 : i32
    %c0_i32_0 = arith.constant 0 : i32
    return %arg0, %c0_i32 : i32, i32
  }
}

</mosaic_0001>

<bundles_post_ra>
// kernel: mf_forward.2
= control target key start
LH: loop header
LB: loop body
LE: loop exit
PB: predicated region body
PF: predicated region fallthrough
CT: control target
= control target key end

     0   :  { %vm638_vm4 = vcmask 130048   ;;  %s1024_s0 = inlined_call_operand.vmem [shape: f32[128,16], index: 0, kind: input, shape index: {}]   ;;  %s1025_s1 = inlined_call_operand.vmem [shape: f32[128,16], index: 1, kind: input, shape index: {}]   ;;  %s1026_s2 = inlined_call_operand.<no memory space> [shape: f32[], index: 2, kind: input, shape index: {}]   ;;  %s1027_s3 = inlined_call_operand.vmem [shape: pred[128], index: 3, kind: input, shape index: {}]   ;;  %s1028_s4 = inlined_call_operand.vmem [shape: pred[128], index: 4, kind: input, shape index: {}]   ;;  %s1029_s5 = inlined_call_operand.vmem [shape: f32[128,1], index: 5, kind: output, shape index: {}]  }
   0x1   :  { %v771_v0 = vstv %s1026_s2  ;;  %v55_v1 = vld [vmem:[%s1028_s4] ss:$0 sm:$0xff]  ;;  %v708_v22 = vld [vmem:[%s1025_s1 + $0x8] sm:$0xff]  ;;  %v709_v31 = vld [vmem:[%s1025_s1 + $0x10] sm:$0xff] }
   0x2   :  { %v58_v2 = vand.u32 255, %v55_v1  ;;  %v322_v3 = vld [vmem:[%s1027_s3] ss:$0 sm:$0xff]  ;;  %v723_v23 = vld [vmem:[%s1024_s0 + $0x8] sm:$0xff]  ;;  %v725_v32 = vld [vmem:[%s1024_s0 + $0x18] sm:$0xff] }
   0x3   :  { %v325_v4 = vand.u32 255, %v322_v3  ;;  %v20_v21 = vld [vmem:[%s1025_s1] sm:$0xff]  ;;  %v724_v33 = vld [vmem:[%s1024_s0 + $0x10] sm:$0xff]  ;;  %v710_v36 = vld [vmem:[%s1025_s1 + $0x18] sm:$0xff] }
   0x4   :  { %61 = vbcast.lane.b32.xlu1 %v58_v2, 272  ;;  %26 = vbcast.lane.b32.xlu0 %v58_v2, 256  ;;  %v305_v24 = vld [vmem:[%s1024_s0] sm:$0xff]  ;;  %v727_v46 = vld [vmem:[%s1024_s0 + $0x28] sm:$0xff]  ;;  %v713_v57 = vld [vmem:[%s1025_s1 + $0x30] sm:$0xff] }
   0x5   :  { %v711_v45 = vld [vmem:[%s1025_s1 + $0x20] sm:$0xff]  ;;  %v712_v52 = vld [vmem:[%s1025_s1 + $0x28] sm:$0xff]  ;;  %v729_v58 = vld [vmem:[%s1024_s0 + $0x38] sm:$0xff] }
   0x6   :  { %v726_v47 = vld [vmem:[%s1024_s0 + $0x20] sm:$0xff]  ;;  %v728_v59 = vld [vmem:[%s1024_s0 + $0x30] sm:$0xff]  ;;  %v714_v62 = vld [vmem:[%s1025_s1 + $0x38] sm:$0xff] }
   0x8   :  { %79 = vbcast.lane.b32.xlu1 %v58_v2, 280  ;;  %43 = vbcast.lane.b32.xlu0 %v58_v2, 264 }
   0xc   :  { %115 = vbcast.lane.b32.xlu1 %v58_v2, 296  ;;  %97 = vbcast.lane.b32.xlu0 %v58_v2, 288 }
  0x10   :  { %151 = vbcast.lane.b32.xlu1 %v58_v2, 312  ;;  %133 = vbcast.lane.b32.xlu0 %v58_v2, 304 }
  0x14   :  { %187 = vbcast.lane.b32.xlu1 %v58_v2, 328  ;;  %169 = vbcast.lane.b32.xlu0 %v58_v2, 320 }
  0x18   :  { %223 = vbcast.lane.b32.xlu1 %v58_v2, 344  ;;  %205 = vbcast.lane.b32.xlu0 %v58_v2, 336 }
  0x1c   :  { %259 = vbcast.lane.b32.xlu1 %v58_v2, 360  ;;  %241 = vbcast.lane.b32.xlu0 %v58_v2, 352 }
  0x20   :  { %295 = vbcast.lane.b32.xlu1 %v58_v2, 376  ;;  %277 = vbcast.lane.b32.xlu0 %v58_v2, 368 }
  0x24   :  { %328 = vbcast.lane.b32.xlu1 %v325_v4, 264  ;;  %311 = vbcast.lane.b32.xlu0 %v325_v4, 256 }
  0x28   :  { %364 = vbcast.lane.b32.xlu1 %v325_v4, 280  ;;  %346 = vbcast.lane.b32.xlu0 %v325_v4, 272 }
  0x2c   :  { %400 = vbcast.lane.b32.xlu1 %v325_v4, 296  ;;  %382 = vbcast.lane.b32.xlu0 %v325_v4, 288 }
  0x30   :  { %436 = vbcast.lane.b32.xlu1 %v325_v4, 312  ;;  %418 = vbcast.lane.b32.xlu0 %v325_v4, 304 }
  0x34   :  { %472 = vbcast.lane.b32.xlu1 %v325_v4, 328  ;;  %454 = vbcast.lane.b32.xlu0 %v325_v4, 320 }
  0x38   :  { %508 = vbcast.lane.b32.xlu1 %v325_v4, 344  ;;  %490 = vbcast.lane.b32.xlu0 %v325_v4, 336 }
  0x3c   :  { %544 = vbcast.lane.b32.xlu1 %v325_v4, 360  ;;  %526 = vbcast.lane.b32.xlu0 %v325_v4, 352 }
  0x40   :  { %580 = vbcast.lane.b32.xlu1 %v325_v4, 376  ;;  %562 = vbcast.lane.b32.xlu0 %v325_v4, 368 }
  0x76   :  { %v62_v5 = vpop.permute.xlu1 %61  ;;  %v27_v6 = vpop.permute.xlu0 %26 }
  0x77   :  { %vm30_vm0 = vcmp.ne.s32.totalorder %v27_v6, 0  ;;  %vm65_vm5 = vcmp.ne.s32.totalorder %v62_v5, 0 }
  0x78   :  { %v31_v27 = vsel %vm30_vm0, %v20_v21, %v771_v0  ;;  %v66_v41 = vsel %vm65_vm5, %v709_v31, %v771_v0  ;;  %v732_v31 = vld [vmem:[%s1024_s0 + $0x50] sm:$0xff] }
  0x7a   :  { %v80_v7 = vpop.permute.xlu1 %79  ;;  %v44_v8 = vpop.permute.xlu0 %43 }
  0x7b   :  { %vm47_vm1 = vcmp.ne.s32.totalorder %v44_v8, 0  ;;  %vm83_vm6 = vcmp.ne.s32.totalorder %v80_v7, 0 }
  0x7c   :  { %v48_v28 = vsel %vm47_vm1, %v708_v22, %v771_v0  ;;  %v84_v44 = vsel %vm83_vm6, %v710_v36, %v771_v0 }
  0x7e   :  { %v779_v9 = vpop.permute.xlu1 %115  ;;  %v98_v10 = vpop.permute.xlu0 %97 }
  0x7f   :  { %vm101_vm9 = vcmp.ne.s32.totalorder %v98_v10, 0  ;;  %vm119_vm10 = vcmp.ne.s32.totalorder %v779_v9, 0  ;;  %v715_v9 = vld [vmem:[%s1025_s1 + $0x40] sm:$0xff]  ;;  %v731_v10 = vld [vmem:[%s1024_s0 + $0x48] sm:$0xff] }
  0x80   :  { %v102_v54 = vsel %vm101_vm9, %v711_v45, %v771_v0  ;;  %v120_v61 = vsel %vm119_vm10, %v712_v52, %v771_v0 }
  0x82   :  { %v781_v11 = vpop.permute.xlu1 %151  ;;  %v783_v12 = vpop.permute.xlu0 %133 }
  0x83   :  { %vm137_vm13 = vcmp.ne.s32.totalorder %v783_v12, 0  ;;  %vm155_vm14 = vcmp.ne.s32.totalorder %v781_v11, 0  ;;  %v730_v11 = vld [vmem:[%s1024_s0 + $0x40] sm:$0xff] }
  0x84   :  { %v138_v5 = vsel %vm137_vm13, %v713_v57, %v771_v0  ;;  %v156_v8 = vsel %vm155_vm14, %v714_v62, %v771_v0 }
  0x86   :  { %v785_v13 = vpop.permute.xlu1 %187  ;;  %v787_v14 = vpop.permute.xlu0 %169 }
  0x87   :  { %vm173_vm1 = vcmp.ne.s32.totalorder %v787_v14, 0 }
  0x8a   :  { %v789_v15 = vpop.permute.xlu1 %223  ;;  %v791_v16 = vpop.permute.xlu0 %205 }
  0x8b   :  { %vm209_vm6 = vcmp.ne.s32.totalorder %v791_v16, 0 }
  0x8e   :  { %v793_v17 = vpop.permute.xlu1 %259  ;;  %v795_v18 = vpop.permute.xlu0 %241 }
  0x8f   :  { %vm245_vm10 = vcmp.ne.s32.totalorder %v795_v18, 0 }
  0x92   :  { %v797_v19 = vpop.permute.xlu1 %295  ;;  %v799_v20 = vpop.permute.xlu0 %277 }
  0x93   :  { %vm281_vm14 = vcmp.ne.s32.totalorder %v799_v20, 0  ;;  %v722_v20 = vld [vmem:[%s1025_s1 + $0x78] sm:$0xff] }
  0x96   :  { %v329_v25 = vpop.permute.xlu1 %328  ;;  %v312_v26 = vpop.permute.xlu0 %311 }
  0x97   :  { %vm332_vm2 = vcmp.ne.s32.totalorder %v329_v25, 0  ;;  %vm315_vm3 = vcmp.ne.s32.totalorder %v312_v26, 0  ;;  %v174_v26 = vsel %vm173_vm1, %v715_v9, %v771_v0 }
  0x98   :  { %v333_v29 = vsel %vm332_vm2, %v723_v23, %v771_v0  ;;  %v316_v30 = vsel %vm315_vm3, %v305_v24, %v771_v0  ;;  %vm191_vm2 = vcmp.ne.s32.totalorder %v785_v13, 0  ;;  %v716_v24 = vld [vmem:[%s1025_s1 + $0x48] sm:$0xff] }
  0x99   :  { %v623_v34 = vmul.f32 %v333_v29, %v48_v28  ;;  %v622_v35 = vmul.f32 %v316_v30, %v31_v27  ;;  %v717_v29 = vld [vmem:[%s1025_s1 + $0x50] sm:$0xff]  ;;  %v733_v30 = vld [vmem:[%s1024_s0 + $0x58] sm:$0xff] }
  0x9a   :  { %v365_v37 = vpop.permute.xlu1 %364  ;;  %v347_v38 = vpop.permute.xlu0 %346 }
  0x9b   :  { %vm368_vm7 = vcmp.ne.s32.totalorder %v365_v37, 0  ;;  %vm350_vm8 = vcmp.ne.s32.totalorder %v347_v38, 0  ;;  %v642_v39 = vsel %vm638_vm4, %v623_v34, 0.0  ;;  %v639_v40 = vsel %vm638_vm4, %v622_v35, 0.0  ;;  %v718_v34 = vld [vmem:[%s1025_s1 + $0x58] sm:$0xff] }
  0x9c   :  { %v369_v42 = vsel %vm368_vm7, %v725_v32, %v771_v0  ;;  %v351_v43 = vsel %vm350_vm8, %v724_v33, %v771_v0  ;;  %643 = vadd.xlane.f32.xlu1 %v642_v39  ;;  %640 = vadd.xlane.f32.xlu0 %v639_v40  ;;  %v192_v33 = vsel %vm191_vm2, %v716_v24, %v771_v0  ;;  %vm227_vm7 = vcmp.ne.s32.totalorder %v789_v15, 0  ;;  %v719_v15 = vld [vmem:[%s1025_s1 + $0x60] sm:$0xff] }
  0x9d   :  { %v624_v48 = vmul.f32 %v351_v43, %v66_v41  ;;  %v625_v51 = vmul.f32 %v369_v42, %v84_v44  ;;  %v210_v39 = vsel %vm209_vm6, %v717_v29, %v771_v0  ;;  %v228_v41 = vsel %vm227_vm7, %v718_v34, %v771_v0  ;;  %v735_v42 = vld [vmem:[%s1024_s0 + $0x68] sm:$0xff]  ;;  %v734_v43 = vld [vmem:[%s1024_s0 + $0x60] sm:$0xff] }
  0x9e   :  { %v401_v49 = vpop.permute.xlu1 %400  ;;  %v383_v50 = vpop.permute.xlu0 %382  ;;  %vm687_vm2 = vcmask 7168  }
  0x9f   :  { %vm404_vm11 = vcmp.ne.s32.totalorder %v401_v49, 0  ;;  %vm386_vm12 = vcmp.ne.s32.totalorder %v383_v50, 0  ;;  %v645_v53 = vsel %vm638_vm4, %v624_v48, 0.0  ;;  %v648_v2 = vsel %vm638_vm4, %v625_v51, 0.0  ;;  %v720_v48 = vld [vmem:[%s1025_s1 + $0x68] sm:$0xff] }
  0xa0   :  { %v405_v55 = vsel %vm404_vm11, %v727_v46, %v771_v0  ;;  %v387_v56 = vsel %vm386_vm12, %v726_v47, %v771_v0  ;;  %646 = vadd.xlane.f32.xlu0 %v645_v53  ;;  %vm263_vm11 = vcmp.ne.s32.totalorder %v793_v17, 0  ;;  %v246_v50 = vsel %vm245_vm10, %v719_v15, %v771_v0  ;;  %v721_v53 = vld [vmem:[%s1025_s1 + $0x70] sm:$0xff] }
  0xa1   :  { %v626_v60 = vmul.f32 %v387_v56, %v102_v54  ;;  %v627_v4 = vmul.f32 %v405_v55, %v120_v61  ;;  %v737_v54 = vld [vmem:[%s1024_s0 + $0x78] sm:$0xff]  ;;  %v736_v55 = vld [vmem:[%s1024_s0 + $0x70] sm:$0xff]  ;;  %v264_v57 = vsel %vm263_vm11, %v720_v48, %v771_v0 }
  0xa2   :  { %v437_v63 = vpop.permute.xlu1 %436  ;;  %v419_v1 = vpop.permute.xlu0 %418 }
  0xa3   :  { %vm440_vm15 = vcmp.ne.s32.totalorder %v437_v63, 0  ;;  %vm422_vm0 = vcmp.ne.s32.totalorder %v419_v1, 0  ;;  %v651_v3 = vsel %vm638_vm4, %v626_v60, 0.0  ;;  %v654_v25 = vsel %vm638_vm4, %v627_v4, 0.0 }
  0xa4   :  { %v441_v6 = vsel %vm440_vm15, %v729_v58, %v771_v0  ;;  %v423_v7 = vsel %vm422_vm0, %v728_v59, %v771_v0  ;;  %652 = vadd.xlane.f32.xlu1 %v651_v3  ;;  %649 = vadd.xlane.f32.xlu0 %v648_v2  ;;  %vm299_vm15 = vcmp.ne.s32.totalorder %v797_v19, 0  ;;  %v282_v63 = vsel %vm281_vm14, %v721_v53, %v771_v0 }
  0xa5   :  { %v628_v12 = vmul.f32 %v423_v7, %v138_v5  ;;  %v629_v23 = vmul.f32 %v441_v6, %v156_v8  ;;  %v300_v2 = vsel %vm299_vm15, %v722_v20, %v771_v0 }
  0xa6   :  { %v473_v21 = vpop.permute.xlu1 %472  ;;  %v455_v22 = vpop.permute.xlu0 %454 }
  0xa7   :  { %vm476_vm3 = vcmp.ne.s32.totalorder %v473_v21, 0  ;;  %vm458_vm5 = vcmp.ne.s32.totalorder %v455_v22, 0  ;;  %v657_v14 = vsel %vm638_vm4, %v628_v12, 0.0  ;;  %v660_v36 = vsel %vm638_vm4, %v629_v23, 0.0 }
  0xa8   :  { %v477_v27 = vsel %vm476_vm3, %v731_v10, %v771_v0  ;;  %v459_v28 = vsel %vm458_vm5, %v730_v11, %v771_v0  ;;  %658 = vadd.xlane.f32.xlu1 %v657_v14  ;;  %655 = vadd.xlane.f32.xlu0 %v654_v25 }
  0xa9   :  { %v630_v32 = vmul.f32 %v459_v28, %v174_v26  ;;  %v631_v38 = vmul.f32 %v477_v27, %v192_v33 }
  0xaa   :  { %v509_v16 = vpop.permute.xlu1 %508  ;;  %v491_v35 = vpop.permute.xlu0 %490 }
  0xab   :  { %vm512_vm8 = vcmp.ne.s32.totalorder %v509_v16, 0  ;;  %vm494_vm9 = vcmp.ne.s32.totalorder %v491_v35, 0  ;;  %v663_v37 = vsel %vm638_vm4, %v630_v32, 0.0  ;;  %v666_v49 = vsel %vm638_vm4, %v631_v38, 0.0 }
  0xac   :  { %v513_v13 = vsel %vm512_vm8, %v733_v30, %v771_v0  ;;  %v495_v40 = vsel %vm494_vm9, %v732_v31, %v771_v0  ;;  %664 = vadd.xlane.f32.xlu1 %v663_v37  ;;  %661 = vadd.xlane.f32.xlu0 %v660_v36 }
  0xad   :  { %v632_v44 = vmul.f32 %v495_v40, %v210_v39  ;;  %v633_v47 = vmul.f32 %v513_v13, %v228_v41 }
  0xae   :  { %v545_v45 = vpop.permute.xlu1 %544  ;;  %v527_v46 = vpop.permute.xlu0 %526 }
  0xaf   :  { %vm548_vm12 = vcmp.ne.s32.totalorder %v545_v45, 0  ;;  %vm530_vm13 = vcmp.ne.s32.totalorder %v527_v46, 0  ;;  %v669_v18 = vsel %vm638_vm4, %v632_v44, 0.0  ;;  %v672_v60 = vsel %vm638_vm4, %v633_v47, 0.0 }
  0xb0   :  { %v549_v51 = vsel %vm548_vm12, %v735_v42, %v771_v0  ;;  %v531_v52 = vsel %vm530_vm13, %v734_v43, %v771_v0  ;;  %670 = vadd.xlane.f32.xlu1 %v669_v18  ;;  %667 = vadd.xlane.f32.xlu0 %v666_v49 }
  0xb1   :  { %v634_v56 = vmul.f32 %v531_v52, %v246_v50  ;;  %v635_v62 = vmul.f32 %v549_v51, %v264_v57 }
  0xb2   :  { %v581_v58 = vpop.permute.xlu1 %580  ;;  %v563_v59 = vpop.permute.xlu0 %562 }
  0xb3   :  { %vm584_vm0 = vcmp.ne.s32.totalorder %v581_v58, 0  ;;  %vm566_vm1 = vcmp.ne.s32.totalorder %v563_v59, 0  ;;  %v675_v61 = vsel %vm638_vm4, %v634_v56, 0.0  ;;  %v678_v4 = vsel %vm638_vm4, %v635_v62, 0.0 }
  0xb4   :  { %v585_v17 = vsel %vm584_vm0, %v737_v54, %v771_v0  ;;  %v567_v1 = vsel %vm566_vm1, %v736_v55, %v771_v0  ;;  %676 = vadd.xlane.f32.xlu1 %v675_v61  ;;  %673 = vadd.xlane.f32.xlu0 %v672_v60 }
  0xb5   :  { %v636_v19 = vmul.f32 %v567_v1, %v282_v63  ;;  %v637_v5 = vmul.f32 %v585_v17, %v300_v2 }
  0xb7   :  { %v681_v3 = vsel %vm638_vm4, %v636_v19, 0.0  ;;  %v684_v6 = vsel %vm638_vm4, %v637_v5, 0.0 }
  0xb8   :  { %682 = vadd.xlane.f32.xlu1 %v681_v3  ;;  %679 = vadd.xlane.f32.xlu0 %v678_v4 }
  0xbc   :  { %685 = vadd.xlane.f32.xlu0 %v684_v6 }
 0x129   :  { %v644_v7 = vpop.xlane.xlu1 %643  ;;  %v641_v8 = vpop.xlane.xlu0 %640 }
 0x12a   :  { %689 = vst.msk [vmem:[%s1029_s5 + $0x8] sm:$0xff] %vm687_vm2, %v644_v7  ;;  %688 = vst.msk [vmem:[%s1029_s5] sm:$0xff] %vm687_vm2, %v641_v8 }
 0x12d   :  { %v647_v0 = vpop.xlane.xlu0 %646 }
 0x12e   :  { %690 = vst.msk [vmem:[%s1029_s5 + $0x10] sm:$0xff] %vm687_vm2, %v647_v0 }
 0x131   :  { %v653_v9 = vpop.xlane.xlu1 %652  ;;  %v650_v10 = vpop.xlane.xlu0 %649 }
 0x132   :  { %692 = vst.msk [vmem:[%s1029_s5 + $0x20] sm:$0xff] %vm687_vm2, %v653_v9  ;;  %691 = vst.msk [vmem:[%s1029_s5 + $0x18] sm:$0xff] %vm687_vm2, %v650_v10 }
 0x135   :  { %v659_v11 = vpop.xlane.xlu1 %658  ;;  %v656_v12 = vpop.xlane.xlu0 %655 }
 0x136   :  { %694 = vst.msk [vmem:[%s1029_s5 + $0x30] sm:$0xff] %vm687_vm2, %v659_v11  ;;  %693 = vst.msk [vmem:[%s1029_s5 + $0x28] sm:$0xff] %vm687_vm2, %v656_v12 }
 0x139   :  { %v665_v21 = vpop.xlane.xlu1 %664  ;;  %v662_v22 = vpop.xlane.xlu0 %661 }
 0x13a   :  { %696 = vst.msk [vmem:[%s1029_s5 + $0x40] sm:$0xff] %vm687_vm2, %v665_v21  ;;  %695 = vst.msk [vmem:[%s1029_s5 + $0x38] sm:$0xff] %vm687_vm2, %v662_v22 }
 0x13d   :  { %v671_v23 = vpop.xlane.xlu1 %670  ;;  %v668_v24 = vpop.xlane.xlu0 %667 }
 0x13e   :  { %698 = vst.msk [vmem:[%s1029_s5 + $0x50] sm:$0xff] %vm687_vm2, %v671_v23  ;;  %697 = vst.msk [vmem:[%s1029_s5 + $0x48] sm:$0xff] %vm687_vm2, %v668_v24 }
 0x141   :  { %v677_v14 = vpop.xlane.xlu1 %676  ;;  %v674_v25 = vpop.xlane.xlu0 %673 }
 0x142   :  { %700 = vst.msk [vmem:[%s1029_s5 + $0x60] sm:$0xff] %vm687_vm2, %v677_v14  ;;  %699 = vst.msk [vmem:[%s1029_s5 + $0x58] sm:$0xff] %vm687_vm2, %v674_v25 }
 0x145   :  { %v683_v26 = vpop.xlane.xlu1 %682  ;;  %v680_v27 = vpop.xlane.xlu0 %679 }
 0x146   :  { %702 = vst.msk [vmem:[%s1029_s5 + $0x70] sm:$0xff] %vm687_vm2, %v683_v26  ;;  %701 = vst.msk [vmem:[%s1029_s5 + $0x68] sm:$0xff] %vm687_vm2, %v680_v27 }
 0x149   :  { %v686_v28 = vpop.xlane.xlu0 %685 }
 0x14a   :  { %703 = vst.msk [vmem:[%s1029_s5 + $0x78] sm:$0xff] %vm687_vm2, %v686_v28 }

</bundles_post_ra>
